<compile_context>
chip_gen: v5e
topology: v5e:2x2
jax: 0.10.0
libtpu: 0.0.40
codegen_flags: <defaults>
</compile_context>

<pallas_src>
import jax
import jax.numpy as jnp
from jax import lax
from jax.experimental import pallas as pl
from jax.experimental.pallas import tpu as pltpu


def _round_up(n: int, m: int) -> int:
    return ((n + m - 1) // m) * m


# ----------------------------------------------------------------------------
# Kernel: one batch tile of  out = relu(x @ w1 + b1) @ w2 + b2
# ----------------------------------------------------------------------------
def _mlp_kernel(x_ref, w1_ref, b1_ref, w2_ref, b2_ref, o_ref):
    # fc1 on the MXU: cast the f32 x tile to the weights' dtype (bf16) in
    # registers (cheap VPU op, hidden under the MXU); f32 accumulation.
    x = x_ref[...].astype(w1_ref.dtype)
    h = jnp.dot(x, w1_ref[...], preferred_element_type=jnp.float32)
    # Bias as a (1, H) row broadcast + ReLU, all in f32 on the VPU.
    h = jnp.maximum(h + b1_ref[...], 0.0)
    # fc2 on the MXU (activations re-cast to the MXU dtype), f32 accumulation.
    out = jnp.dot(h.astype(w2_ref.dtype), w2_ref[...],
                  preferred_element_type=jnp.float32)
    o_ref[...] = (out + b2_ref[...]).astype(o_ref.dtype)


def _resident_spec(block_shape):
    """BlockSpec for a constant-index (VMEM-resident) operand.

    The block index never changes across the grid, so a second pipeline buffer
    is pure VMEM waste (matters for large H on v7x's 64 MiB VMEM).  Use
    single-buffering when this jax version supports pipeline_mode; otherwise
    fall back to the default spec.
    """
    index_map = lambda i: (0, 0)
    if hasattr(pl, "Buffered"):
        try:
            return pl.BlockSpec(block_shape, index_map,
                                pipeline_mode=pl.Buffered(buffer_count=1))
        except (TypeError, ValueError):
            pass
    return pl.BlockSpec(block_shape, index_map)


# ----------------------------------------------------------------------------
# One-time parameter preparation (hoisted out of the per-call path)
# ----------------------------------------------------------------------------
def prepare_params(w1, b1, w2, b2, *, param_dtype=jnp.bfloat16):
    """Pad the hidden dim to a 128-lane multiple and cast weights for the MXU.

    Call ONCE (e.g. right after init / weight update); every forward call then
    reuses the padded tensors, so per-call HBM traffic is only x and out.
    Padded hidden columns get zero weights and zero bias, so ReLU keeps them
    at exactly 0 and the padded w2 rows contribute nothing.
    Use param_dtype=jnp.float32 for exact f32 parity with the torch model.
    """
    d_in, H = w1.shape
    d_out = w2.shape[1]
    hp = _round_up(H, 128)
    w1p = jnp.zeros((d_in, hp), param_dtype).at[:, :H].set(w1.astype(param_dtype))
    b1p = jnp.zeros((1, hp), jnp.float32).at[:, :H].set(
        jnp.reshape(b1, (1, H)).astype(jnp.float32))
    w2p = jnp.zeros((hp, d_out), param_dtype).at[:H, :].set(w2.astype(param_dtype))
    b2p = jnp.reshape(b2, (1, d_out)).astype(jnp.float32)
    return w1p, b1p, w2p, b2p


# ----------------------------------------------------------------------------
# Forward pass
# ----------------------------------------------------------------------------
def trade_model_forward(x, params, *, block_b: int = 512):
    """Fused fc1 -> relu -> fc2.

    x:      (B, d_in) float32
    params: output of prepare_params (padded bf16 weights + f32 biases)
    returns (B, d_out) float32
    """
    w1p, b1p, w2p, b2p = params
    B, d_in = x.shape
    hp = w1p.shape[1]
    d_out = w2p.shape[1]
    assert w1p.shape[0] == d_in and w2p.shape[0] == hp

    # ---- batch tiling -------------------------------------------------------
    if B <= 128:
        # Tiny batch: one grid step, tile == full batch, no padding, no slice.
        tb, bp = B, B
    else:
        # At least 2 grid steps (so both TensorCores get work on v7x), tile a
        # multiple of 16 (bf16 sublane packing), capped at block_b rows.
        half = _round_up((B + 1) // 2, 16)
        tb = max(16, min(_round_up(block_b, 16), half))
        bp = _round_up(B, tb)
    grid = (bp // tb,)

    # Pad the batch only when needed (padded rows are sliced off at the end;
    # note they produce relu(b1) != 0 garbage, never reduce over them).
    x_in = x if bp == B else jnp.zeros((bp, d_in), x.dtype).at[:B].set(x)

    # ---- VMEM budget (x/out double-buffered, weights single-buffered, plus
    #      the hidden (tb, hp) activation and in-register bf16 copies) --------
    w_item = jnp.dtype(w1p.dtype).itemsize
    est = (2 * tb * d_in * 4                      # x tiles (f32, 2 buffers)
           + 2 * tb * d_out * 4                   # out tiles (f32, 2 buffers)
           + (w1p.size + w2p.size) * w_item       # resident weights
           + (b1p.size + b2p.size) * 4            # resident biases
           + tb * hp * (4 + w_item)               # h f32 + bf16 copy for fc2
           + tb * d_in * w_item)                  # bf16 copy of x
    vmem_limit = int(min(64 << 20, max(32 << 20, 2 * est + (4 << 20))))

    cost = pl.CostEstimate(
        flops=2 * bp * (d_in * hp + hp * d_out),
        transcendentals=0,
        bytes_accessed=(x_in.size * 4
                        + (w1p.size + w2p.size) * w_item
                        + (b1p.size + b2p.size) * 4
                        + bp * d_out * 4),
    )

    out = pl.pallas_call(
        _mlp_kernel,
        out_shape=jax.ShapeDtypeStruct((bp, d_out), jnp.float32),
        grid=grid,
        in_specs=[
            pl.BlockSpec((tb, d_in), lambda i: (i, 0)),   # x streams (2 bufs)
            _resident_spec((d_in, hp)),                   # w1 resident
            _resident_spec((1, hp)),                      # b1 resident
            _resident_spec((hp, d_out)),                  # w2 resident
            _resident_spec((1, d_out)),                   # b2 resident
        ],
        out_specs=pl.BlockSpec((tb, d_out), lambda i: (i, 0)),
        compiler_params=pltpu.CompilerParams(
            # Batch axis is embarrassingly parallel -> shards across both
            # TensorCores on v7x; harmless on single-TC v5e/v6e.
            dimension_semantics=("parallel",),
            vmem_limit_bytes=vmem_limit,
        ),
        cost_estimate=cost,
    )(x_in, w1p, b1p, w2p, b2p)

    return out if bp == B else out[:B]


def init_params(key, input_dim, hidden_dim, output_dim):
    """Deterministic init mimicking nn.Linear's U(-1/sqrt(fan_in), 1/sqrt(fan_in))."""
    k1, k2, k3, k4 = jax.random.split(key, 4)
    bound1 = 1.0 / jnp.sqrt(float(input_dim))
    bound2 = 1.0 / jnp.sqrt(float(hidden_dim))
    w1 = jax.random.uniform(k1, (input_dim, hidden_dim), jnp.float32, -bound1, bound1)
    b1 = jax.random.uniform(k2, (1, hidden_dim), jnp.float32, -bound1, bound1)
    w2 = jax.random.uniform(k3, (hidden_dim, output_dim), jnp.float32, -bound2, bound2)
    b2 = jax.random.uniform(k4, (1, output_dim), jnp.float32, -bound2, bound2)
    return w1, b1, w2, b2


if __name__ == "__main__":
    key = jax.random.PRNGKey(0)
    k_x, k_x2, k_p = jax.random.split(key, 3)

    input_dim, hidden_dim, output_dim = 16, 32, 8

    w1, b1, w2, b2 = init_params(k_p, input_dim, hidden_dim, output_dim)
    params = prepare_params(w1, b1, w2, b2)   # done ONCE, reused by every call

    def ref_f32(x):
        # The exact torch-equivalent f32 forward.
        h = jnp.maximum(jnp.dot(x, w1, precision=lax.Precision.HIGHEST) + b1, 0.0)
        return jnp.dot(h, w2, precision=lax.Precision.HIGHEST) + b2

    def ref_bf16(x):
        # Mirrors the kernel's rounding exactly: bf16 MXU inputs with f32
        # accumulation AND bf16 re-quantization of h before fc2.
        f32 = jnp.float32
        xb = x.astype(jnp.bfloat16).astype(f32)
        w1b = w1.astype(jnp.bfloat16).astype(f32)
        w2b = w2.astype(jnp.bfloat16).astype(f32)
        h = jnp.maximum(jnp.dot(xb, w1b, precision=lax.Precision.HIGHEST) + b1, 0.0)
        hb = h.astype(jnp.bfloat16).astype(f32)
        return jnp.dot(hb, w2b, precision=lax.Precision.HIGHEST) + b2

    # Case 1: tiny batch -> single grid step, no padding, no output slice.
    x_small = jax.random.normal(k_x, (32, input_dim), jnp.float32)
    out_small = jax.block_until_ready(trade_model_forward(x_small, params))
    assert out_small.shape == (32, output_dim)
    assert jnp.allclose(out_small, ref_bf16(x_small), atol=2e-3, rtol=2e-3)
    assert jnp.allclose(out_small, ref_f32(x_small), atol=3e-2, rtol=3e-2)

    # Case 2: larger batch -> 2 "parallel" grid steps with batch padding/slice.
    x_big = jax.random.normal(k_x2, (200, input_dim), jnp.float32)
    out_big = jax.block_until_ready(trade_model_forward(x_big, params))
    assert out_big.shape == (200, output_dim)
    assert jnp.allclose(out_big, ref_bf16(x_big), atol=2e-3, rtol=2e-3)
    assert jnp.allclose(out_big, ref_f32(x_big), atol=3e-2, rtol=3e-2)

    print("KERNEL_OK")
</pallas_src>

<mosaic_0001>
module attributes {stable_mosaic.version = 11 : i64} {
  func.func @_mlp_kernel(%arg0: i32, %arg1: memref<32x16xf32, #tpu.memory_space<vmem>>, %arg2: memref<16x128xbf16, #tpu.memory_space<vmem>>, %arg3: memref<1x128xf32, #tpu.memory_space<vmem>>, %arg4: memref<128x8xbf16, #tpu.memory_space<vmem>>, %arg5: memref<1x8xf32, #tpu.memory_space<vmem>>, %arg6: memref<32x8xf32, #tpu.memory_space<vmem>>) attributes {dimension_semantics = [#tpu.dimension_semantics<parallel>], iteration_bounds = array<i64: 1>, scalar_prefetch = 0 : i64, scratch_operands = 0 : i64, tpu.core_type = #tpu.core_type<tc>, window_params = [{transform_indices = @transform_0, window_bounds = array<i64: 32, 16>}, {pipeline_mode = #tpu.pipeline_mode<synchronous>, transform_indices = @transform_1, window_bounds = array<i64: 16, 128>}, {pipeline_mode = #tpu.pipeline_mode<synchronous>, transform_indices = @transform_2, window_bounds = array<i64: 1, 128>}, {pipeline_mode = #tpu.pipeline_mode<synchronous>, transform_indices = @transform_3, window_bounds = array<i64: 128, 8>}, {pipeline_mode = #tpu.pipeline_mode<synchronous>, transform_indices = @transform_4, window_bounds = array<i64: 1, 8>}, {transform_indices = @transform_5, window_bounds = array<i64: 32, 8>}]} {
    %c0 = arith.constant 0 : index
    %c0_0 = arith.constant 0 : index
    %0 = vector.load %arg1[%c0, %c0_0] : memref<32x16xf32, #tpu.memory_space<vmem>>, vector<32x16xf32>
    %1 = arith.truncf %0 : vector<32x16xf32> to vector<32x16xbf16>
    %c0_1 = arith.constant 0 : index
    %c0_2 = arith.constant 0 : index
    %2 = vector.load %arg2[%c0_1, %c0_2] : memref<16x128xbf16, #tpu.memory_space<vmem>>, vector<16x128xbf16>
    %cst = arith.constant dense<0.000000e+00> : vector<32x128xf32>
    %3 = tpu.matmul %1, %2, %cst {dimension_numbers = #tpu.dot_dimension_numbers<[1], [0], [0], [1], [0, 0, 1, 1], [], []>} : vector<32x16xbf16>, vector<16x128xbf16>, vector<32x128xf32> -> vector<32x128xf32>
    %c0_3 = arith.constant 0 : index
    %c0_4 = arith.constant 0 : index
    %4 = vector.load %arg3[%c0_3, %c0_4] : memref<1x128xf32, #tpu.memory_space<vmem>>, vector<1x128xf32>
    %5 = vector.broadcast %4 : vector<1x128xf32> to vector<32x128xf32>
    %6 = arith.addf %3, %5 : vector<32x128xf32>
    %cst_5 = arith.constant 0.000000e+00 : f32
    %7 = vector.broadcast %cst_5 : f32 to vector<32x128xf32>
    %8 = arith.maximumf %6, %7 : vector<32x128xf32>
    %9 = arith.truncf %8 : vector<32x128xf32> to vector<32x128xbf16>
    %c0_6 = arith.constant 0 : index
    %c0_7 = arith.constant 0 : index
    %10 = vector.load %arg4[%c0_6, %c0_7] : memref<128x8xbf16, #tpu.memory_space<vmem>>, vector<128x8xbf16>
    %cst_8 = arith.constant dense<0.000000e+00> : vector<32x8xf32>
    %11 = tpu.matmul %9, %10, %cst_8 {dimension_numbers = #tpu.dot_dimension_numbers<[1], [0], [0], [1], [0, 0, 1, 1], [], []>} : vector<32x128xbf16>, vector<128x8xbf16>, vector<32x8xf32> -> vector<32x8xf32>
    %c0_9 = arith.constant 0 : index
    %c0_10 = arith.constant 0 : index
    %12 = vector.load %arg5[%c0_9, %c0_10] : memref<1x8xf32, #tpu.memory_space<vmem>>, vector<1x8xf32>
    %13 = vector.broadcast %12 : vector<1x8xf32> to vector<32x8xf32>
    %14 = arith.addf %11, %13 : vector<32x8xf32>
    %c0_11 = arith.constant 0 : index
    %c0_12 = arith.constant 0 : index
    %15 = vector.load %arg6[%c0_11, %c0_12] : memref<32x8xf32, #tpu.memory_space<vmem>>, vector<32x8xf32>
    tpu.vector_store %arg6[%c0_11, %c0_12], %14 {strides = array<i32>} : memref<32x8xf32, #tpu.memory_space<vmem>>, vector<32x8xf32>,
    return
  }
  func.func @transform_0(%arg0: i32) -> (i32, i32) {
    %c0_i32 = arith.constant 0 : i32
    %c0_i32_0 = arith.constant 0 : i32
    return %arg0, %c0_i32 : i32, i32
  }
  func.func @transform_1(%arg0: i32) -> (i32, i32) {
    %c0_i32 = arith.constant 0 : i32
    %c0_i32_0 = arith.constant 0 : i32
    %c0_i32_1 = arith.constant 0 : i32
    return %c0_i32, %c0_i32_0 : i32, i32
  }
  func.func @transform_2(%arg0: i32) -> (i32, i32) {
    %c0_i32 = arith.constant 0 : i32
    %c0_i32_0 = arith.constant 0 : i32
    %c0_i32_1 = arith.constant 0 : i32
    return %c0_i32, %c0_i32_0 : i32, i32
  }
  func.func @transform_3(%arg0: i32) -> (i32, i32) {
    %c0_i32 = arith.constant 0 : i32
    %c0_i32_0 = arith.constant 0 : i32
    %c0_i32_1 = arith.constant 0 : i32
    return %c0_i32, %c0_i32_0 : i32, i32
  }
  func.func @transform_4(%arg0: i32) -> (i32, i32) {
    %c0_i32 = arith.constant 0 : i32
    %c0_i32_0 = arith.constant 0 : i32
    %c0_i32_1 = arith.constant 0 : i32
    return %c0_i32, %c0_i32_0 : i32, i32
  }
  func.func @transform_5(%arg0: i32) -> (i32, i32) {
    %c0_i32 = arith.constant 0 : i32
    %c0_i32_0 = arith.constant 0 : i32
    return %arg0, %c0_i32 : i32, i32
  }
}

</mosaic_0001>

<bundles_post_ra>
// kernel: tpu_custom_call.1
= control target key start
LH: loop header
LB: loop body
LE: loop exit
PB: predicated region body
PF: predicated region fallthrough
CT: control target
= control target key end

     0   :  { %vm39_vm0 = vcmask 130048   ;;  %vm158_vm1 = vcmask 64512   ;;  %s313_s1 = inlined_call_operand.vmem [shape: bf16[16,128], index: 1, kind: input, shape index: {}]   ;;  %s314_s0 = inlined_call_operand.vmem [shape: f32[32,16], index: 0, kind: input, shape index: {}]   ;;  %s315_s3 = inlined_call_operand.vmem [shape: bf16[128,8], index: 3, kind: input, shape index: {}]   ;;  %s316_s2 = inlined_call_operand.vmem [shape: f32[1,128], index: 2, kind: input, shape index: {}]   ;;  %s317_s4 = inlined_call_operand.vmem [shape: f32[1,8], index: 4, kind: input, shape index: {}]   ;;  %s318_s5 = inlined_call_operand.vmem [shape: f32[32,8], index: 5, kind: output, shape index: {}]  }
   0x1   :  { %v205_v0 = vld [vmem:[%s313_s1] sm:$0xff]  ;;  %v22_v2 = vld [vmem:[%s314_s0 + $0x8] sm:$0xff]  ;;  %v213_v4 = vld [vmem:[%s315_s3 + $0x38] sm:$0xff] }
   0x2   :  { %v21_v1 = vld [vmem:[%s314_s0] sm:$0xff]  ;;  %53 = vmatpush.bf16.msra.mxu0 %v205_v0  ;;  %139 = vmatpush.bf16.msra.mxu1 %v213_v4  ;;  %v212_v5 = vld [vmem:[%s315_s3 + $0x30] sm:$0xff]  ;;  %v211_v6 = vld [vmem:[%s315_s3 + $0x28] sm:$0xff] }
   0x3   :  { %v25_v3 = vpack.c.bf16 %v22_v2, %v21_v1  ;;  %214 = vmatpush.bf16.msra.mxu2 %v213_v4  ;;  %v210_v7 = vld [vmem:[%s315_s3 + $0x20] sm:$0xff]  ;;  %v23_v8 = vld [vmem:[%s314_s0 + $0x10] sm:$0xff]  ;;  %v24_v9 = vld [vmem:[%s314_s0 + $0x18] sm:$0xff] }
   0x4   :  { %v26_v10 = vpack.c.bf16 %v24_v9, %v23_v8  ;;  %v209_v11 = vld [vmem:[%s315_s3 + $0x18] sm:$0xff]  ;;  %v208_v12 = vld [vmem:[%s315_s3 + $0x10] sm:$0xff]  ;;  %v207_v13 = vld [vmem:[%s315_s3 + $0x8] sm:$0xff] }
   0x5   :  { %171 = vmatmul.msk.bf16.vlgmr.msra.gmra.mxu0 %vm39_vm0, %v25_v3  ;;  %v206_v14 = vld [vmem:[%s315_s3] sm:$0xff] }
   0x6   :  { %140 = vmatpush.bf16.msra.mxu1 %v212_v5  ;;  %v222_v16 = vld [vmem:[%s316_s2] ss:$0 sm:$0xff] }
   0x7   :  { %215 = vmatpush.bf16.msra.mxu2 %v212_v5  ;;  %v223_v30 = vld [vmem:[%s317_s4] ss:$0 sm:$0xff] }
   0xa   :  { %141 = vmatpush.bf16.msra.mxu1 %v211_v6 }
   0xb   :  { %216 = vmatpush.bf16.msra.mxu2 %v211_v6 }
   0xe   :  { %142 = vmatpush.bf16.msra.mxu1 %v210_v7 }
   0xf   :  { %217 = vmatpush.bf16.msra.mxu2 %v210_v7 }
  0x12   :  { %143 = vmatpush.bf16.msra.mxu1 %v209_v11 }
  0x13   :  { %218 = vmatpush.bf16.msra.mxu2 %v209_v11 }
  0x15   :  { %172 = vmatmul.msk.bf16.gmra.mxu0 %vm39_vm0, %v26_v10 }
  0x16   :  { %144 = vmatpush.bf16.msra.mxu1 %v208_v12 }
  0x17   :  { %219 = vmatpush.bf16.msra.mxu2 %v208_v12 }
  0x1a   :  { %145 = vmatpush.bf16.msra.mxu1 %v207_v13 }
  0x1b   :  { %220 = vmatpush.bf16.msra.mxu2 %v207_v13 }
  0x1e   :  { %146 = vmatpush.bf16.msra.mxu1 %v206_v14 }
  0x1f   :  { %221 = vmatpush.bf16.msra.mxu2 %v206_v14 }
  0x82   :  { %v55_v15 = vpop.f32.mrf.mxu0 }
  0x83   :  { %v56_v17 = vadd.f32 %v222_v16, %v55_v15 }
  0x85   :  { %v65_v20 = vmax.f32 %v56_v17, 0.0 }
  0x8a   :  { %v57_v18 = vpop.f32.mrf.mxu0 }
  0x8b   :  { %v58_v19 = vadd.f32 %v222_v16, %v57_v18 }
  0x8d   :  { %v66_v21 = vmax.f32 %v58_v19, 0.0 }
  0x8f   :  { %v69_v22 = vpack.c.bf16 %v66_v21, %v65_v20 }
  0x91   :  { %147 = vmatmul.bf16.vlgmr.msra.gmra.mxu1 %v69_v22 }
  0x92   :  { %v60_v23 = vpop.f32.mrf.mxu0 }
  0x93   :  { %v61_v24 = vadd.f32 %v222_v16, %v60_v23 }
  0x95   :  { %v67_v27 = vmax.f32 %v61_v24, 0.0 }
  0x9a   :  { %v62_v25 = vpop.f32.mrf.mxu0 }
  0x9b   :  { %v63_v26 = vadd.f32 %v222_v16, %v62_v25 }
  0x9d   :  { %v68_v28 = vmax.f32 %v63_v26, 0.0 }
  0x9f   :  { %v70_v29 = vpack.c.bf16 %v68_v28, %v67_v27 }
  0xa1   :  { %152 = vmatmul.bf16.vlgmr.msra.gmra.mxu2 %v70_v29 }
 0x10e   :  { %v148_v31 = vpop.f32.mrf.mxu1 }
 0x10f   :  { %v149_v32 = vadd.f32 %v223_v30, %v148_v31 }
 0x111   :  { %159 = vst.msk [vmem:[%s318_s5] sm:$0xff] %vm158_vm1, %v149_v32 }
 0x116   :  { %v150_v33 = vpop.f32.mrf.mxu1 }
 0x117   :  { %v151_v34 = vadd.f32 %v223_v30, %v150_v33 }
 0x119   :  { %160 = vst.msk [vmem:[%s318_s5 + $0x8] sm:$0xff] %vm158_vm1, %v151_v34 }
 0x124   :  { %v153_v35 = vpop.f32.mrf.mxu2 }
 0x125   :  { %v154_v36 = vadd.f32 %v223_v30, %v153_v35 }
 0x127   :  { %161 = vst.msk [vmem:[%s318_s5 + $0x10] sm:$0xff] %vm158_vm1, %v154_v36 }
 0x12c   :  { %v155_v37 = vpop.f32.mrf.mxu2 }
 0x12d   :  { %v156_v38 = vadd.f32 %v223_v30, %v155_v37 }
 0x12f   :  { %162 = vst.msk [vmem:[%s318_s5 + $0x18] sm:$0xff] %vm158_vm1, %v156_v38 }

</bundles_post_ra>
